<compile_context>
chip_gen: v6e
topology: v6e:2x2x1
jax: 0.10.0
libtpu: 0.0.40
codegen_flags: <defaults>
</compile_context>

<pallas_src>
import functools

import jax
import jax.numpy as jnp
from jax import lax
from jax.experimental import pallas as pl
from jax.experimental.pallas import tpu as pltpu

_LANE = 128
_SUBLANE = 8
_MAX_FEATURE_TILE = 2048      # multiple of 128; fits every generation's VMEM
_MAX_BATCH_TILE = 256
_VMEM_LIMIT_BYTES = 48 * 1024 * 1024


def _round_up(x, m):
    return ((x + m - 1) // m) * m


def _pick_feature_tile(d_in_pad):
    """Largest multiple-of-128 divisor of d_in_pad that is <= _MAX_FEATURE_TILE."""
    best = _LANE
    t = _LANE
    while t <= min(_MAX_FEATURE_TILE, d_in_pad):
        if d_in_pad % t == 0:
            best = t
        t += _LANE
    return best


# --------------------------------------------------------------------------
# Fused encoder + decoder kernel
# --------------------------------------------------------------------------
def _fused_ae_kernel(x_ref, we_ref, be_ref, wd_ref, bd_ref, z_ref, xo_ref, *,
                     n_enc):
    """Phase j < n_enc : z += x_tile @ We_tile^T  (bias+tanh at j == n_enc-1)
       Phase j >= n_enc: x_out_tile = z @ Wd_tile + bd_tile

    x_ref  : [TB, FT]     f32 input tile (cast to bf16 in-kernel)
    we_ref : [dim_z, FT]  bf16 encoder weight tile (natural orientation)
    be_ref : [1, dim_z]   f32 encoder bias
    wd_ref : [dim_z, FT]  bf16 decoder weight tile
    bd_ref : [1, FT]      f32 decoder bias tile
    z_ref  : [TB, dim_z]  f32 latent output; revisited block == accumulator
    xo_ref : [TB, FT]     f32 reconstruction tile
    """
    j = pl.program_id(1)

    # ----- encoder phase -----------------------------------------------------
    @pl.when(j == 0)
    def _():
        z_ref[...] = jnp.zeros_like(z_ref)

    @pl.when(j < n_enc)
    def _():
        x_bf = x_ref[...].astype(we_ref.dtype)            # f32 -> bf16 in-kernel
        z_ref[...] += lax.dot_general(                    # [TB,FT] x [Z,FT] -> [TB,Z]
            x_bf, we_ref[...],
            dimension_numbers=(((1,), (1,)), ((), ())),
            preferred_element_type=jnp.float32)

    @pl.when(j == n_enc - 1)
    def _():
        z_ref[...] = jnp.tanh(z_ref[...] + be_ref[...])

    # ----- decoder phase ------------------------------------------------------
    @pl.when(j >= n_enc)
    def _():
        zb = z_ref[...].astype(wd_ref.dtype)              # bf16 feed to the MXU
        xo = jnp.dot(zb, wd_ref[...],
                     preferred_element_type=jnp.float32) + bd_ref[...]
        xo_ref[...] = xo.astype(xo_ref.dtype)


# --------------------------------------------------------------------------
# One-time parameter prep (out of the per-call path)
# --------------------------------------------------------------------------
def prepare_params(params, compute_dtype=jnp.bfloat16):
    """Cast the two weight streams to bf16, keep dim_z exact (no lane pad),
    zero-pad D_in only up to the next multiple of 128."""
    dim_z, d_in = params["enc_w"].shape
    d_in_pad = _round_up(d_in, _LANE)

    we = jnp.zeros((dim_z, d_in_pad), compute_dtype).at[:, :d_in].set(
        params["enc_w"].astype(compute_dtype))                      # natural (Z, D)
    be = params["enc_b"].astype(jnp.float32).reshape(1, dim_z)
    wd = jnp.zeros((dim_z, d_in_pad), compute_dtype).at[:, :d_in].set(
        params["dec_w"].T.astype(compute_dtype))                    # (Z, D)
    bd = jnp.zeros((1, d_in_pad), jnp.float32).at[0, :d_in].set(
        params["dec_b"].astype(jnp.float32))
    return {"we": we, "be": be, "wd": wd, "bd": bd}


# --------------------------------------------------------------------------
# Forward pass
# --------------------------------------------------------------------------
@jax.jit
def deterministic_ae_forward(x, we, be, wd, bd):
    """x: [B, C, H, W] f32 (NCHW). Returns (z_context, x_out) like PyTorch."""
    B, C, H, W = x.shape
    d_in = C * H * W
    dim_z, d_in_pad = we.shape

    ft = _pick_feature_tile(d_in_pad)          # feature tile (encoder K / decoder N)
    n_feat = d_in_pad // ft
    n_enc = n_feat                             # encoder reduction steps

    # Batch tiling: single tile rounded to 8 when small; ~balanced 8-multiple
    # tiles (minimal padding) when large.
    if B <= _MAX_BATCH_TILE:
        tb = _round_up(B, _SUBLANE)
        b_pad = tb
    else:
        n_bt = -(-B // _MAX_BATCH_TILE)
        tb = _round_up(-(-B // n_bt), _SUBLANE)
        b_pad = _round_up(B, tb)

    x_flat = x.reshape(B, d_in)                # NCHW flatten: layout-free
    pad_b, pad_f = b_pad - B, d_in_pad - d_in
    if pad_b or pad_f:
        x_flat = jnp.pad(x_flat, ((0, pad_b), (0, pad_f)))

    grid = (b_pad // tb, n_enc + n_feat)
    kernel = functools.partial(_fused_ae_kernel, n_enc=n_enc)

    # Index maps "freeze" (min/max) so encoder-side blocks are not re-fetched
    # during the decoder phase and the Wd tile for step 0 is already resident.
    z_pad, xo_pad = pl.pallas_call(
        kernel,
        out_shape=(jax.ShapeDtypeStruct((b_pad, dim_z), jnp.float32),
                   jax.ShapeDtypeStruct((b_pad, d_in_pad), x.dtype)),
        grid_spec=pltpu.PrefetchScalarGridSpec(
            num_scalar_prefetch=0,
            grid=grid,
            in_specs=[
                pl.BlockSpec((tb, ft),                         # x tile
                             lambda i, j: (i, jnp.minimum(j, n_enc - 1))),
                pl.BlockSpec((dim_z, ft),                      # We tile
                             lambda i, j: (0, jnp.minimum(j, n_enc - 1))),
                pl.BlockSpec((1, dim_z), lambda i, j: (0, 0)), # be (tiny)
                pl.BlockSpec((dim_z, ft),                      # Wd tile
                             lambda i, j: (0, jnp.maximum(j - n_enc, 0))),
                pl.BlockSpec((1, ft),                          # bd tile
                             lambda i, j: (0, jnp.maximum(j - n_enc, 0))),
            ],
            out_specs=(
                pl.BlockSpec((tb, dim_z), lambda i, j: (i, 0)),   # z (resident)
                pl.BlockSpec((tb, ft),
                             lambda i, j: (i, jnp.maximum(j - n_enc, 0))),
            ),
        ),
        compiler_params=pltpu.CompilerParams(
            dimension_semantics=("parallel", "arbitrary"),
            vmem_limit_bytes=_VMEM_LIMIT_BYTES,
        ),
    )(x_flat, we, be, wd, bd)

    z = z_pad if b_pad == B else z_pad[:B]
    xo = xo_pad if (b_pad == B and d_in_pad == d_in) else xo_pad[:B, :d_in]
    x_out = xo.reshape(B, C, H, W)
    z_context = z.astype(x.dtype)   # no quantizer / context_model / midi concat
    return z_context, x_out


# --------------------------------------------------------------------------
# Deterministic parameter init (nn.Linear conventions)
# --------------------------------------------------------------------------
def _init_params(key, c, h, w, dim_z):
    d_in = c * h * w
    k1, k2, k3, k4 = jax.random.split(key, 4)
    s_e = 1.0 / jnp.sqrt(d_in)
    s_d = 1.0 / jnp.sqrt(dim_z)
    return {
        "enc_w": jax.random.uniform(k1, (dim_z, d_in), jnp.float32, -s_e, s_e),
        "enc_b": jax.random.uniform(k2, (dim_z,), jnp.float32, -s_e, s_e),
        "dec_w": jax.random.uniform(k3, (d_in, dim_z), jnp.float32, -s_d, s_d),
        "dec_b": jax.random.uniform(k4, (d_in,), jnp.float32, -s_d, s_d),
    }


if __name__ == "__main__":
    B, C, H, W = 2, 4, 16, 16
    DIM_Z = 32

    key = jax.random.PRNGKey(0)
    kx, kp = jax.random.split(key)
    x = jax.random.normal(kx, (B, C, H, W), dtype=jnp.float32)
    params = _init_params(kp, C, H, W, DIM_Z)

    prepped = prepare_params(params)                      # one-time weight prep
    z_context, x_out = deterministic_ae_forward(
        x, prepped["we"], prepped["be"], prepped["wd"], prepped["bd"])
    jax.block_until_ready((z_context, x_out))

    assert z_context.shape == (B, DIM_Z)
    assert x_out.shape == (B, C, H, W)

    # Reference with the same bf16-rounded streams (f32 accumulation).
    x_flat = x.reshape(B, -1)
    x_f = x_flat.astype(jnp.bfloat16).astype(jnp.float32)
    we_f = params["enc_w"].astype(jnp.bfloat16).astype(jnp.float32)   # (Z, D)
    wd_f = params["dec_w"].astype(jnp.bfloat16).astype(jnp.float32)   # (D, Z)
    z_ref = jnp.tanh(x_f @ we_f.T + params["enc_b"])
    z_ref_b = z_ref.astype(jnp.bfloat16).astype(jnp.float32)
    xo_ref = (z_ref_b @ wd_f.T + params["dec_b"]).reshape(B, C, H, W)
    assert jnp.allclose(z_context, z_ref, atol=2e-2)
    assert jnp.allclose(x_out, xo_ref, atol=2e-2)

    print("KERNEL_OK")
</pallas_src>

<mosaic_0001>
module attributes {stable_mosaic.version = 11 : i64} {
  func.func @_fused_ae_kernel(%arg0: i32, %arg1: i32, %arg2: memref<8x1024xf32, #tpu.memory_space<vmem>>, %arg3: memref<32x1024xbf16, #tpu.memory_space<vmem>>, %arg4: memref<1x32xf32, #tpu.memory_space<vmem>>, %arg5: memref<32x1024xbf16, #tpu.memory_space<vmem>>, %arg6: memref<1x1024xf32, #tpu.memory_space<vmem>>, %arg7: memref<8x32xf32, #tpu.memory_space<vmem>>, %arg8: memref<8x1024xf32, #tpu.memory_space<vmem>>) attributes {dimension_semantics = [#tpu.dimension_semantics<parallel>, #tpu.dimension_semantics<arbitrary>], iteration_bounds = array<i64: 1, 2>, scalar_prefetch = 0 : i64, scratch_operands = 0 : i64, tpu.core_type = #tpu.core_type<tc>, window_params = [{transform_indices = @transform_0, window_bounds = array<i64: 8, 1024>}, {transform_indices = @transform_1, window_bounds = array<i64: 32, 1024>}, {pipeline_mode = #tpu.pipeline_mode<synchronous>, transform_indices = @transform_2, window_bounds = array<i64: 1, 32>}, {transform_indices = @transform_3, window_bounds = array<i64: 32, 1024>}, {transform_indices = @transform_4, window_bounds = array<i64: 1, 1024>}, {transform_indices = @transform_5, window_bounds = array<i64: 8, 32>}, {transform_indices = @transform_6, window_bounds = array<i64: 8, 1024>}]} {
    %c0_i32 = arith.constant 0 : i32
    %0 = arith.cmpi eq, %arg1, %c0_i32 : i32
    %1 = arith.extui %0 : i1 to i32
    %c0_i32_0 = arith.constant 0 : i32
    %2 = arith.cmpi ne, %1, %c0_i32_0 : i32
    scf.if %2 {
      %cst = arith.constant 0.000000e+00 : f32
      %12 = vector.broadcast %cst : f32 to vector<8x32xf32>
      %c0 = arith.constant 0 : index
      %c0_6 = arith.constant 0 : index
      %13 = vector.load %arg7[%c0, %c0_6] : memref<8x32xf32, #tpu.memory_space<vmem>>, vector<8x32xf32>
      tpu.vector_store %arg7[%c0, %c0_6], %12 {strides = array<i32>} : memref<8x32xf32, #tpu.memory_space<vmem>>, vector<8x32xf32>,
    } else {
    }
    %c1_i32 = arith.constant 1 : i32
    %3 = arith.cmpi slt, %arg1, %c1_i32 : i32
    %4 = arith.extui %3 : i1 to i32
    %c0_i32_1 = arith.constant 0 : i32
    %5 = arith.cmpi ne, %4, %c0_i32_1 : i32
    scf.if %5 {
      %c0 = arith.constant 0 : index
      %c0_6 = arith.constant 0 : index
      %12 = vector.load %arg2[%c0, %c0_6] : memref<8x1024xf32, #tpu.memory_space<vmem>>, vector<8x1024xf32>
      %13 = arith.truncf %12 : vector<8x1024xf32> to vector<8x1024xbf16>
      %c0_7 = arith.constant 0 : index
      %c0_8 = arith.constant 0 : index
      %14 = vector.load %arg7[%c0_7, %c0_8] : memref<8x32xf32, #tpu.memory_space<vmem>>, vector<8x32xf32>
      %c0_9 = arith.constant 0 : index
      %c0_10 = arith.constant 0 : index
      %15 = vector.load %arg3[%c0_9, %c0_10] : memref<32x1024xbf16, #tpu.memory_space<vmem>>, vector<32x1024xbf16>
      %cst = arith.constant dense<0.000000e+00> : vector<8x32xf32>
      %16 = tpu.matmul %13, %15, %cst {dimension_numbers = #tpu.dot_dimension_numbers<[1], [1], [0], [0], [0, 0, 1, 0], [], []>} : vector<8x1024xbf16>, vector<32x1024xbf16>, vector<8x32xf32> -> vector<8x32xf32>
      %17 = arith.addf %14, %16 : vector<8x32xf32>
      %c0_11 = arith.constant 0 : index
      %c0_12 = arith.constant 0 : index
      %18 = vector.load %arg7[%c0_11, %c0_12] : memref<8x32xf32, #tpu.memory_space<vmem>>, vector<8x32xf32>
      tpu.vector_store %arg7[%c0_11, %c0_12], %17 {strides = array<i32>} : memref<8x32xf32, #tpu.memory_space<vmem>>, vector<8x32xf32>,
    } else {
    }
    %c0_i32_2 = arith.constant 0 : i32
    %6 = arith.cmpi eq, %arg1, %c0_i32_2 : i32
    %7 = arith.extui %6 : i1 to i32
    %c0_i32_3 = arith.constant 0 : i32
    %8 = arith.cmpi ne, %7, %c0_i32_3 : i32
    scf.if %8 {
      %c0 = arith.constant 0 : index
      %c0_6 = arith.constant 0 : index
      %12 = vector.load %arg7[%c0, %c0_6] : memref<8x32xf32, #tpu.memory_space<vmem>>, vector<8x32xf32>
      %c0_7 = arith.constant 0 : index
      %c0_8 = arith.constant 0 : index
      %13 = vector.load %arg4[%c0_7, %c0_8] : memref<1x32xf32, #tpu.memory_space<vmem>>, vector<1x32xf32>
      %14 = vector.broadcast %13 : vector<1x32xf32> to vector<8x32xf32>
      %15 = arith.addf %12, %14 : vector<8x32xf32>
      %16 = math.tanh %15 : vector<8x32xf32>
      %c0_9 = arith.constant 0 : index
      %c0_10 = arith.constant 0 : index
      %17 = vector.load %arg7[%c0_9, %c0_10] : memref<8x32xf32, #tpu.memory_space<vmem>>, vector<8x32xf32>
      tpu.vector_store %arg7[%c0_9, %c0_10], %16 {strides = array<i32>} : memref<8x32xf32, #tpu.memory_space<vmem>>, vector<8x32xf32>,
    } else {
    }
    %c1_i32_4 = arith.constant 1 : i32
    %9 = arith.cmpi sge, %arg1, %c1_i32_4 : i32
    %10 = arith.extui %9 : i1 to i32
    %c0_i32_5 = arith.constant 0 : i32
    %11 = arith.cmpi ne, %10, %c0_i32_5 : i32
    scf.if %11 {
      %c0 = arith.constant 0 : index
      %c0_6 = arith.constant 0 : index
      %12 = vector.load %arg7[%c0, %c0_6] : memref<8x32xf32, #tpu.memory_space<vmem>>, vector<8x32xf32>
      %13 = arith.truncf %12 : vector<8x32xf32> to vector<8x32xbf16>
      %c0_7 = arith.constant 0 : index
      %c0_8 = arith.constant 0 : index
      %14 = vector.load %arg5[%c0_7, %c0_8] : memref<32x1024xbf16, #tpu.memory_space<vmem>>, vector<32x1024xbf16>
      %cst = arith.constant dense<0.000000e+00> : vector<8x1024xf32>
      %15 = tpu.matmul %13, %14, %cst {dimension_numbers = #tpu.dot_dimension_numbers<[1], [0], [0], [1], [0, 0, 1, 1], [], []>} : vector<8x32xbf16>, vector<32x1024xbf16>, vector<8x1024xf32> -> vector<8x1024xf32>
      %c0_9 = arith.constant 0 : index
      %c0_10 = arith.constant 0 : index
      %16 = vector.load %arg6[%c0_9, %c0_10] : memref<1x1024xf32, #tpu.memory_space<vmem>>, vector<1x1024xf32>
      %17 = vector.broadcast %16 : vector<1x1024xf32> to vector<8x1024xf32>
      %18 = arith.addf %15, %17 : vector<8x1024xf32>
      %c0_11 = arith.constant 0 : index
      %c0_12 = arith.constant 0 : index
      %19 = vector.load %arg8[%c0_11, %c0_12] : memref<8x1024xf32, #tpu.memory_space<vmem>>, vector<8x1024xf32>
      tpu.vector_store %arg8[%c0_11, %c0_12], %18 {strides = array<i32>} : memref<8x1024xf32, #tpu.memory_space<vmem>>, vector<8x1024xf32>,
    } else {
    }
    return
  }
  func.func @transform_0(%arg0: i32, %arg1: i32) -> (i32, i32) {
    %c0_i32 = arith.constant 0 : i32
    %0 = arith.minsi %arg1, %c0_i32 : i32
    %c0_i32_0 = arith.constant 0 : i32
    return %arg0, %0 : i32, i32
  }
  func.func @transform_1(%arg0: i32, %arg1: i32) -> (i32, i32) {
    %c0_i32 = arith.constant 0 : i32
    %0 = arith.minsi %arg1, %c0_i32 : i32
    %c0_i32_0 = arith.constant 0 : i32
    %c0_i32_1 = arith.constant 0 : i32
    return %c0_i32_0, %0 : i32, i32
  }
  func.func @transform_2(%arg0: i32, %arg1: i32) -> (i32, i32) {
    %c0_i32 = arith.constant 0 : i32
    %c0_i32_0 = arith.constant 0 : i32
    %c0_i32_1 = arith.constant 0 : i32
    return %c0_i32, %c0_i32_0 : i32, i32
  }
  func.func @transform_3(%arg0: i32, %arg1: i32) -> (i32, i32) {
    %c1_i32 = arith.constant 1 : i32
    %0 = arith.subi %arg1, %c1_i32 : i32
    %c0_i32 = arith.constant 0 : i32
    %1 = arith.maxsi %0, %c0_i32 : i32
    %c0_i32_0 = arith.constant 0 : i32
    %c0_i32_1 = arith.constant 0 : i32
    return %c0_i32_0, %1 : i32, i32
  }
  func.func @transform_4(%arg0: i32, %arg1: i32) -> (i32, i32) {
    %c1_i32 = arith.constant 1 : i32
    %0 = arith.subi %arg1, %c1_i32 : i32
    %c0_i32 = arith.constant 0 : i32
    %1 = arith.maxsi %0, %c0_i32 : i32
    %c0_i32_0 = arith.constant 0 : i32
    %c0_i32_1 = arith.constant 0 : i32
    return %c0_i32_0, %1 : i32, i32
  }
  func.func @transform_5(%arg0: i32, %arg1: i32) -> (i32, i32) {
    %c0_i32 = arith.constant 0 : i32
    %c0_i32_0 = arith.constant 0 : i32
    return %arg0, %c0_i32 : i32, i32
  }
  func.func @transform_6(%arg0: i32, %arg1: i32) -> (i32, i32) {
    %c1_i32 = arith.constant 1 : i32
    %0 = arith.subi %arg1, %c1_i32 : i32
    %c0_i32 = arith.constant 0 : i32
    %1 = arith.maxsi %0, %c0_i32 : i32
    %c0_i32_0 = arith.constant 0 : i32
    return %arg0, %1 : i32, i32
  }
}

</mosaic_0001>

<bundles_post_ra>
// kernel: deterministic_ae_forward.1
= control target key start
LH: loop header
LB: loop body
LE: loop exit
PB: predicated region body
PF: predicated region fallthrough
CT: control target
= control target key end

     0   :  { %12 = vsyncpa [#allocation3], 0  ;;  %s1677_s0 = inlined_call_operand.vmem [shape: f32[8,1024], index: 0, kind: input, shape index: {}]   ;;  %s1678_s1 = inlined_call_operand.vmem [shape: bf16[32,1024], index: 1, kind: input, shape index: {}]   ;;  %s1679_s2 = inlined_call_operand.vmem [shape: f32[1,32], index: 2, kind: input, shape index: {}]   ;;  %s1680_s3 = inlined_call_operand.hbm [shape: bf16[32,1024], index: 3, kind: input, shape index: {}]   ;;  %s1681_s4 = inlined_call_operand.vmem [shape: f32[1,1024], index: 4, kind: input, shape index: {}]   ;;  %s1682_s5 = inlined_call_operand.vmem [shape: f32[8,32], index: 5, kind: output, shape index: {0}]   ;;  %s1683_s6 = inlined_call_operand.vmem [shape: f32[8,1024], index: 6, kind: output, shape index: {1}]  }
   0x1   :  { %14 = vsyncpa [#allocation3 + $0x1], 0  ;;  %s1498_s21 = smov 0   ;;  %s1500_s22 = smov 0  }
   0x2   :  { %s1502_s23 = smov 0   ;;  %s1504_s24 = smov 0  }
   0x3   :  { %s1506_s25 = smov 0  }
   0x4 LB: > { %s1250_s26 = sadd.s32 4294967295, %s1456_s25   ;;  %s29_s27 = sadd.s32 1, %s1452_s24  ;;  %s1456_s25 = sphi %s1506_s25, %s20_s25   ;;  %s1452_s24 = sphi %s1504_s24, %s1688_s24   ;;  %s1448_s23 = sphi %s1502_s23, %s1687_s23   ;;  %s1444_s22 = sphi %s1500_s22, %s1667_s22   ;;  %s1440_s21 = sphi %s1498_s21, %s1686_s21  }
   0x5   : > { %p30_p0 = scmp.ge.s32.totalorder %s29_s27, 2  ;;  %p1437_p1 = scmp.ne.s32.totalorder %s1444_s22, 0 }
   0x6   : > { %p136_p2 = scmp.eq.s32.totalorder %s1456_s25, 0  ;;  %p141_p3 = scmp.ne.s32.totalorder %s1444_s22, %s1440_s21 }
   0x7   : > { %s1690_s27 = smov (%p30_p0, %s29_s27), 0  ;;  %p142_p4 = scmp.eq.s32.totalorder %s1250_s26, 0 }
   0x8   : > { %p137_p5 = por %p1437_p1, %p136_p2  ;;  %p1326_p7 = scmp.lt.s32.totalorder %s1456_s25, 2 }
   0x9   : > { %p1528_p6 = por %p142_p4, %p141_p3  ;;  %s1458_s29 = smov [#allocation2]  }
   0xa   : > { %s304_s30 = sshll.u32 %s1458_s29, 4  ;;  %p1533_p8 = pnand %p1326_p7, %p137_p5  ;;  %s305_s30 = int_to_ptr.vmem [resolvable:$true] %s304_s30 }
   0xb   : > { %s1394_s8 = scalar_lea.vmem %s305_s30, 2048  ;;  %s1401_s9 = scalar_lea.vmem %s305_s30, 4096 }
   0xc   : > { %p1383_p9 = pneg %p1533_p8  ;;  %p1395_p10 = scmp.ne.s32.totalorder %s305_s30, %s1394_s8 }
   0xd   : > { %p1402_p13 = scmp.lt.s32.totalorder %s305_s30, %s305_s30  ;;  %p1403_p0 = scmp.lt.s32.totalorder %s1401_s9, %s1394_s8 }
   0xe   : > { %p1397_p11 = pnand %p1395_p10, %p1383_p9 }
   0xf   : > { %p1404_p1 = por %p1403_p0, %p1402_p13 }
  0x10   : > { %p1398_p12 = pneg %p1397_p11 }
  0x12   : > { %p1405_p2 = pnand %p1404_p1, %p1398_p12 }
  0x14   : > { %1408 = shalt.err (!%p1405_p2)
}
  0x15   : > { %s1459_s10 = smov 512   ;;  %s1460_s11 = smov 32  }
  0x16   : > { %1325 = dma.hbm_to_vmem [thread:$0]  (!%p1533_p8), %s1680_s3, 2048, %s305_s30, [#allocation3], %s1459_s10, %s1459_s10, %s1460_s11  }
  0x17   : > { %p1264_p3 = scmp.ge.s32.totalorder %s1456_s25, 1  ;;  %p326_p4 = scmp.lt.s32.totalorder %s1456_s25, 3 }
  0x19   : > { %p327_p5 = pnand %p1264_p3, %p326_p4 }
  0x1a   : > { %s332_s14 = sand.u32 (!%p327_p5), 1, %s1444_s22  }
  0x1b   : > { %330 = sbr.rel (%p327_p5) target bundleno = 544 (0x220), region = 40  ;;  %s1265_s15 = sshll.u32 (!%p327_p5), %s332_s14, 7 }
  0x1c   : > { %s333_s16 = scalar_lea.sflag (!%p327_p5), [#allocation3], %s332_s14  ;;  %s1547_s17 = scalar_lea.vmem (!%p327_p5), [#allocation2], %s1265_s15 }
  0x20   : > { %1434 = dma.done.wait (%p1528_p6), %s333_s16, 2048  }
  0x21   : > { %1436 = vsyncadd (%p1528_p6), %s333_s16, 4294965248  ;;  %p401_p7 = scmp.lt.s32.totalorder %s1448_s23, 0  ;;  %s1270_s18 = sadd.s32 4294967295, %s1448_s23 }
  0x22   : > { %p430_p8 = scmp.gt.s32.totalorder %s1270_s18, 0  ;;  %p1275_p6 = scmp.ne.s32.totalorder %s1448_s23, 0 }
  0x23   : > { %s402_s19 = scalar_select %p401_p7, %s1448_s23, 0 }
  0x24   : > { %s1692_s18 = smov (!%p430_p8, %s1270_s18), 0 }
  0x25   : > { %s1266_s20 = sshll.u32 %s402_s19, 3  ;;  %s1271_s21 = sshll.u32 %s1692_s18, 3 }
  0x26   : > { %p406_p9 = scmp.lt.s32.totalorder %s1266_s20, 7  ;;  %p433_p10 = scmp.lt.s32.totalorder %s1271_s21, 7 }
  0x28   : > { %s1694_s20 = smov (!%p406_p9, %s1266_s20), 7  ;;  %s1696_s21 = smov (!%p433_p10, %s1271_s21), 7 }
  0x29   : > { %s1267_s26 = sshll.u32 %s1694_s20, 3  ;;  %s1269_s28 = sshll.u32 %s1694_s20, 2 }
  0x2a   : > { %s1561_s7 = scalar_lea.vmem %s1677_s0, %s1267_s26  ;;  %s1566_s10 = scalar_lea.vmem %s1678_s1, %s1269_s28 }
  0x2b   : > { %s435_s13 = scalar_lea.vmem %s1681_s4, %s1696_s21  ;;  %s1274_s14 = sshll.u32 %s1696_s21, 3 }
  0x2c   : > { %s1576_s18 = scalar_lea.vmem %s1683_s6, %s1274_s14  ;;  %464 = sbr.rel (%p1275_p6) target bundleno = 51 (0x33), region = 48 }
  0x31   : > { %vm465_vm0 = vcmask 261120   ;;  %v1461_v0 = vmov 0.0  }
  0x32   : > { %466 = vst.msk [vmem:[%s1682_s5] sm:$0xff] %vm465_vm0, %v1461_v0 }
  0x33 PF: > { %p1276_p11 = scmp.ge.s32.totalorder %s1448_s23, 1 }
  0x35   : > { %470 = sbr.rel (%p1276_p11) target bundleno = 294 (0x126), region = 52 }
  0x3a   : > { %v496_v1 = vld [vmem:[%s1566_s10 + $0x40] sm:$0xff]  ;;  %v497_v3 = vld [vmem:[%s1566_s10 + $0x48] sm:$0xff]  ;;  %v474_v17 = vld [vmem:[%s1561_s7 + $0x18] sm:$0xff]  ;;  %vm745_vm1 = vcmask 261120  }
  0x3b   : > { %v500_v2 = vld [vmem:[%s1566_s10 + $0x60] sm:$0xff]  ;;  %v501_v5 = vld [vmem:[%s1566_s10 + $0x68] sm:$0xff]  ;;  %v482_v18 = vpack.c.bf16 %v474_v17, %v474_v17  ;;  %v498_v19 = vld [vmem:[%s1566_s10 + $0x50] sm:$0xff] }
  0x3c   : > { %v1286_v4 = vcombine.high %v496_v1, %v500_v2  ;;  %v1285_v6 = vcombine.low %v496_v1, %v500_v2  ;;  %v488_v7 = vld [vmem:[%s1566_s10] sm:$0xff]  ;;  %v1288_v9 = vcombine.high %v497_v3, %v501_v5  ;;  %v1287_v10 = vcombine.low %v497_v3, %v501_v5  ;;  %v489_v12 = vld [vmem:[%s1566_s10 + $0x8] sm:$0xff]  ;;  %v502_v20 = vld [vmem:[%s1566_s10 + $0x70] sm:$0xff] }
  0x3d   : > { %v492_v8 = vld [vmem:[%s1566_s10 + $0x20] sm:$0xff]  ;;  %v493_v13 = vld [vmem:[%s1566_s10 + $0x28] sm:$0xff]  ;;  %656 = vmatprep.mubr.bf16.mxu1 %v482_v18  ;;  %v499_v21 = vld [vmem:[%s1566_s10 + $0x58] sm:$0xff]  ;;  %v1290_v25 = vcombine.high %v498_v19, %v502_v20  ;;  %v1289_v36 = vcombine.low %v498_v19, %v502_v20 }
  0x3e   : > { %v1278_v11 = vcombine.high %v488_v7, %v492_v8  ;;  %v472_v14 = vld [vmem:[%s1561_s7 + $0x8] sm:$0xff]  ;;  %596 = vmatprep.subr.bf16.mxu0 %v1286_v4  ;;  %v1280_v15 = vcombine.high %v489_v12, %v493_v13  ;;  %636 = vmatprep.subr.bf16.mxu1 %v1288_v9  ;;  %v503_v22 = vld [vmem:[%s1566_s10 + $0x78] sm:$0xff]  ;;  %v1277_v23 = vcombine.low %v488_v7, %v492_v8  ;;  %v471_v27 = vld [vmem:[%s1561_s7] sm:$0xff] }
  0x3f   : > { %v480_v16 = vpack.c.bf16 %v472_v14, %v472_v14  ;;  %597 = vmatpush1.bf16.xpose.msra.mxu0 %v1285_v6  ;;  %637 = vmatpush1.bf16.xpose.msra.mxu1 %v1287_v10  ;;  %v1279_v24 = vcombine.low %v489_v12, %v493_v13  ;;  %v1292_v26 = vcombine.high %v499_v21, %v503_v22  ;;  %v473_v28 = vld [vmem:[%s1561_s7 + $0x10] sm:$0xff]  ;;  %v491_v32 = vld [vmem:[%s1566_s10 + $0x18] sm:$0xff]  ;;  %v476_v34 = vld [vmem:[%s1561_s7 + $0x28] sm:$0xff] }
  0x40   : > { %598 = vmatprep.subr.bf16.mxu0 %v1278_v11  ;;  %638 = vmatprep.subr.bf16.mxu1 %v1280_v15  ;;  %v490_v29 = vld [vmem:[%s1566_s10 + $0x10] sm:$0xff]  ;;  %v479_v31 = vpack.c.bf16 %v471_v27, %v471_v27  ;;  %v495_v33 = vld [vmem:[%s1566_s10 + $0x38] sm:$0xff]  ;;  %v481_v35 = vpack.c.bf16 %v473_v28, %v473_v28  ;;  %v1291_v38 = vcombine.low %v499_v21, %v503_v22  ;;  %v475_v45 = vld [vmem:[%s1561_s7 + $0x20] sm:$0xff] }
  0x41   : > { %616 = vmatprep.mubr.bf16.mxu0 %v480_v16  ;;  %v494_v30 = vld [vmem:[%s1566_s10 + $0x30] sm:$0xff]  ;;  %v478_v37 = vld [vmem:[%s1561_s7 + $0x38] sm:$0xff]  ;;  %v1284_v40 = vcombine.high %v491_v32, %v495_v33  ;;  %v484_v41 = vpack.c.bf16 %v476_v34, %v476_v34  ;;  %v1283_v44 = vcombine.low %v491_v32, %v495_v33  ;;  %v483_v47 = vpack.c.bf16 %v475_v45, %v475_v45  ;;  %v487_v61 = vld [vmem:[%s1682_s5] sm:$0xff] }
  0x42   : > { %v1282_v39 = vcombine.high %v490_v29, %v494_v30  ;;  %v486_v42 = vpack.c.bf16 %v478_v37, %v478_v37  ;;  %v1281_v43 = vcombine.low %v490_v29, %v494_v30  ;;  %v477_v46 = vld [vmem:[%s1561_s7 + $0x30] sm:$0xff] }
  0x43   : > { %v485_v48 = vpack.c.bf16 %v477_v46, %v477_v46 }
  0x47   : > { %599 = vmatpush1.bf16.xpose.msra.mxu0 %v1277_v23  ;;  %639 = vmatpush1.bf16.xpose.msra.mxu1 %v1279_v24 }
  0x48   : > { %676 = vmatprep.subr.bf16.mxu0 %v1290_v25  ;;  %716 = vmatprep.subr.bf16.mxu1 %v1292_v26 }
  0x4e   : > { %617 = vmatmul.mubr.bf16.vlgmr.msra.gmra.mxu0 %v479_v31  ;;  %657 = vmatmul.mubr.bf16.vlgmr.msra.gmra.mxu1 %v481_v35 }
  0x4f   : > { %677 = vmatpush1.bf16.xpose.msra.mxu0 %v1289_v36  ;;  %717 = vmatpush1.bf16.xpose.msra.mxu1 %v1291_v38 }
  0x50   : > { %678 = vmatprep.subr.bf16.mxu0 %v1282_v39  ;;  %718 = vmatprep.subr.bf16.mxu1 %v1284_v40 }
  0x51   : > { %696 = vmatprep.mubr.bf16.mxu0 %v484_v41  ;;  %736 = vmatprep.mubr.bf16.mxu1 %v486_v42 }
  0x57   : > { %679 = vmatpush1.bf16.xpose.msra.mxu0 %v1281_v43  ;;  %719 = vmatpush1.bf16.xpose.msra.mxu1 %v1283_v44 }
  0x5e   : > { %697 = vmatmul.mubr.bf16.vlgmr.msra.gmra.mxu0 %v483_v47  ;;  %737 = vmatmul.mubr.bf16.vlgmr.msra.gmra.mxu1 %v485_v48 }
 0x10e   : > { %v618_v49 = vpop.f32.mrf.mxu0  ;;  %v658_v50 = vpop.f32.mrf.mxu1 }
 0x10f   : > { %v659_v57 = vadd.f32 %v658_v50, %v618_v49 }
 0x110   : > { %v620_v51 = vpop.f32.mrf.mxu0  ;;  %v660_v52 = vpop.f32.mrf.mxu1 }
 0x112   : > { %v621_v53 = vpop.f32.mrf.mxu0  ;;  %v661_v54 = vpop.f32.mrf.mxu1 }
 0x114   : > { %v622_v55 = vpop.f32.mrf.mxu0  ;;  %v662_v56 = vpop.f32.mrf.mxu1 }
 0x11e   : > { %v698_v58 = vpop.f32.mrf.mxu0  ;;  %v738_v60 = vpop.f32.mrf.mxu1 }
 0x11f   : > { %v699_v59 = vadd.f32 %v698_v58, %v659_v57 }
 0x120   : > { %v700_v62 = vpop.f32.mrf.mxu0  ;;  %v740_v0 = vpop.f32.mrf.mxu1 }
 0x121   : > { %v739_v63 = vadd.f32 %v738_v60, %v699_v59 }
 0x122   : > { %v701_v1 = vpop.f32.mrf.mxu0  ;;  %v741_v3 = vpop.f32.mrf.mxu1 }
 0x123   : > { %v744_v2 = vadd.f32 %v739_v63, %v487_v61 }
 0x124   : > { %v702_v4 = vpop.f32.mrf.mxu0  ;;  %v742_v5 = vpop.f32.mrf.mxu1 }
 0x125   : > { %746 = vst.msk [vmem:[%s1682_s5] sm:$0xff] %vm745_vm1, %v744_v2 }
 0x126 PF: > { %749 = sbr.rel (%p1275_p6) target bundleno = 318 (0x13e), region = 56 }
 0x12b   : > { %v1294_v7 = vld [vmem:[%s1679_s2] ss:$0 sm:$0xff]  ;;  %vm760_vm2 = vcmask 261120  }
 0x12c   : > { %v750_v6 = vld [vmem:[%s1682_s5] sm:$0xff] }
 0x12d   : > { %v758_v8 = vadd.f32 %v1294_v7, %v750_v6 }
 0x12f   : > { %1379 = vtanh.f32 %v758_v8 }
 0x13c   : > { %v1380_v9 = vpop.eup %1379 }
 0x13d   : > { %761 = vst.msk [vmem:[%s1682_s5] sm:$0xff] %vm760_vm2, %v1380_v9 }
 0x13e PF: > { %p1295_p12 = scmp.lt.s32.totalorder %s1448_s23, 1 }
 0x140   : > { %765 = sbr.rel (%p1295_p12) target bundleno = 544 (0x220), region = 60 }
 0x145   : > { %v776_v10 = vld [vmem:[%s1547_s17 + $0x40] sm:$0xff]  ;;  %v777_v12 = vld [vmem:[%s1547_s17 + $0x48] sm:$0xff]  ;;  %v1462_v18 = vmov 0   ;;  %v778_v25 = vld [vmem:[%s1547_s17 + $0x50] sm:$0xff]  ;;  %vm906_vm3 = vcmask 261120   ;;  %v786_v45 = vlaneseq }
 0x146   : > { %v780_v11 = vld [vmem:[%s1547_s17 + $0x60] sm:$0xff]  ;;  %v781_v14 = vld [vmem:[%s1547_s17 + $0x68] sm:$0xff]  ;;  %942 = vmatprep.mubr.bf16.mxu0 %v1462_v18  ;;  %983 = vmatprep.mubr.bf16.mxu1 %v1462_v18  ;;  %v782_v26 = vld [vmem:[%s1547_s17 + $0x70] sm:$0xff] }
 0x147   : > { %v1305_v13 = vcombine.high %v776_v10, %v780_v11  ;;  %v1304_v15 = vcombine.low %v776_v10, %v780_v11  ;;  %v768_v16 = vld [vmem:[%s1547_s17] sm:$0xff]  ;;  %v1307_v19 = vcombine.high %v777_v12, %v781_v14  ;;  %v1306_v20 = vcombine.low %v777_v12, %v781_v14  ;;  %v769_v22 = vld [vmem:[%s1547_s17 + $0x8] sm:$0xff]  ;;  %v779_v27 = vld [vmem:[%s1547_s17 + $0x58] sm:$0xff] }
 0x148   : > { %v772_v17 = vld [vmem:[%s1547_s17 + $0x20] sm:$0xff]  ;;  %v773_v23 = vld [vmem:[%s1547_s17 + $0x28] sm:$0xff]  ;;  %v783_v30 = vld [vmem:[%s1547_s17 + $0x78] sm:$0xff]  ;;  %v1309_v32 = vcombine.high %v778_v25, %v782_v26  ;;  %v1308_v39 = vcombine.low %v778_v25, %v782_v26  ;;  %v787_v46 = vshrl.u32 %v786_v45, 7 }
 0x149   : > { %v1297_v21 = vcombine.high %v768_v16, %v772_v17  ;;  %922 = vmatprep.subr.bf16.mxu0 %v1305_v13  ;;  %v1299_v24 = vcombine.high %v769_v22, %v773_v23  ;;  %963 = vmatprep.subr.bf16.mxu1 %v1307_v19  ;;  %v1296_v28 = vcombine.low %v768_v16, %v772_v17  ;;  %v766_v29 = vld [vmem:[%s1682_s5] sm:$0xff]  ;;  %v770_v34 = vld [vmem:[%s1547_s17 + $0x10] sm:$0xff]  ;;  %v771_v37 = vld [vmem:[%s1547_s17 + $0x18] sm:$0xff] }
 0x14a   : > { %923 = vmatpush1.bf16.msra.mxu0 %v1304_v15  ;;  %964 = vmatpush1.bf16.msra.mxu1 %v1306_v20  ;;  %v1298_v31 = vcombine.low %v769_v22, %v773_v23  ;;  %v1311_v33 = vcombine.high %v779_v27, %v783_v30  ;;  %v774_v35 = vld [vmem:[%s1547_s17 + $0x30] sm:$0xff]  ;;  %v767_v36 = vpack.c.bf16 %v766_v29, %v766_v29  ;;  %v775_v38 = vld [vmem:[%s1547_s17 + $0x38] sm:$0xff]  ;;  %v788_v47 = vsub.s32 0, %v787_v46  ;;  %v784_v48 = vld [vmem:[%s435_s13] sm:$0xff] }
 0x14b   : > { %924 = vmatprep.subr.bf16.mxu0 %v1297_v21  ;;  %965 = vmatprep.subr.bf16.mxu1 %v1299_v24  ;;  %v1310_v40 = vcombine.low %v779_v27, %v783_v30  ;;  %v1301_v41 = vcombine.high %v770_v34, %v774_v35  ;;  %v1303_v42 = vcombine.high %v771_v37, %v775_v38  ;;  %v792_v49 = vsub.s32 1, %v787_v46 }
 0x14c   : > { %v1300_v43 = vcombine.low %v770_v34, %v774_v35  ;;  %v1302_v44 = vcombine.low %v771_v37, %v775_v38  ;;  %v796_v50 = vsub.s32 2, %v787_v46  ;;  %v789_v51 = vrot.slane %v784_v48, %v788_v47 }
 0x14d   : > { %v800_v52 = vsub.s32 3, %v787_v46  ;;  %v793_v53 = vrot.slane %v784_v48, %v792_v49  ;;  %v804_v59 = vsub.s32 4, %v787_v46  ;;  %v808_v63 = vsub.s32 5, %v787_v46 }
 0x14e   : > { %925 = vmatpush1.bf16.msra.mxu0 %v1296_v28  ;;  %966 = vmatpush1.bf16.msra.mxu1 %v1298_v31  ;;  %v797_v55 = vrot.slane %v784_v48, %v796_v50  ;;  %v812_v2 = vsub.s32 6, %v787_v46  ;;  %v816_v6 = vsub.s32 7, %v787_v46 }
 0x14f   : > { %1004 = vmatprep.subr.bf16.mxu0 %v1309_v32  ;;  %1045 = vmatprep.subr.bf16.mxu1 %v1311_v33  ;;  %v801_v58 = vrot.slane %v784_v48, %v800_v52  ;;  %v805_v5 = vrot.slane %v784_v48, %v804_v59  ;;  %v809_v9 = vrot.slane %v784_v48, %v808_v63 }
 0x150   : > { %v813_v11 = vrot.slane %v784_v48, %v812_v2  ;;  %v817_v14 = vrot.slane %v784_v48, %v816_v6 }
 0x151   : > { %1312 = vmatmul.mubr.msk.bf16.vlgmr.msra.gmra.mxu0 %vm906_vm3, %v767_v36  ;;  %1313 = vmatmul.mubr.msk.bf16.vlgmr.msra.gmra.mxu1 %vm906_vm3, %v767_v36 }
 0x152   : > { %1005 = vmatpush1.bf16.msra.mxu0 %v1308_v39  ;;  %1046 = vmatpush1.bf16.msra.mxu1 %v1310_v40 }
 0x153   : > { %1006 = vmatprep.subr.bf16.mxu0 %v1301_v41  ;;  %1047 = vmatprep.subr.bf16.mxu1 %v1303_v42 }
 0x154   : > { %1024 = vmatprep.mubr.bf16.mxu0 %v1462_v18  ;;  %1065 = vmatprep.mubr.bf16.mxu1 %v1462_v18 }
 0x156   : > { %1007 = vmatpush1.bf16.msra.mxu0 %v1300_v43  ;;  %1048 = vmatpush1.bf16.msra.mxu1 %v1302_v44 }
 0x159   : > { %1314 = vmatmul.mubr.msk.bf16.vlgmr.msra.gmra.mxu0 %vm906_vm3, %v767_v36  ;;  %1315 = vmatmul.mubr.msk.bf16.vlgmr.msra.gmra.mxu1 %vm906_vm3, %v767_v36 }
 0x211   : > { %v944_v54 = vpop.f32.mrf.mxu0  ;;  %v985_v57 = vpop.f32.mrf.mxu1 }
 0x212   : > { %v945_v56 = vadd.f32 %v944_v54, %v789_v51  ;;  %v986_v0 = vadd.f32 %v985_v57, %v797_v55 }
 0x213   : > { %v946_v60 = vpop.f32.mrf.mxu0  ;;  %v987_v62 = vpop.f32.mrf.mxu1 }
 0x214   : > { %1074 = vst [vmem:[%s1576_s18] sm:$0xff] %v945_v56  ;;  %v947_v61 = vadd.f32 %v946_v60, %v793_v53  ;;  %v988_v3 = vadd.f32 %v987_v62, %v801_v58  ;;  %1076 = vst [vmem:[%s1576_s18 + $0x10] sm:$0xff] %v986_v0 }
 0x215   : > { %v948_v1 = vpop.f32.mrf.mxu0  ;;  %v989_v4 = vpop.f32.mrf.mxu1 }
 0x216   : > { %1075 = vst [vmem:[%s1576_s18 + $0x8] sm:$0xff] %v947_v61  ;;  %1077 = vst [vmem:[%s1576_s18 + $0x18] sm:$0xff] %v988_v3 }
 0x217   : > { %v949_v7 = vpop.f32.mrf.mxu0  ;;  %v990_v8 = vpop.f32.mrf.mxu1 }
 0x219   : > { %v1026_v10 = vpop.f32.mrf.mxu0  ;;  %v1067_v13 = vpop.f32.mrf.mxu1 }
 0x21a   : > { %v1027_v12 = vadd.f32 %v1026_v10, %v805_v5  ;;  %v1068_v18 = vadd.f32 %v1067_v13, %v813_v11 }
 0x21b   : > { %v1028_v15 = vpop.f32.mrf.mxu0  ;;  %v1069_v17 = vpop.f32.mrf.mxu1 }
 0x21c   : > { %1078 = vst [vmem:[%s1576_s18 + $0x20] sm:$0xff] %v1027_v12  ;;  %v1029_v16 = vadd.f32 %v1028_v15, %v809_v9  ;;  %v1070_v20 = vadd.f32 %v1069_v17, %v817_v14  ;;  %1080 = vst [vmem:[%s1576_s18 + $0x30] sm:$0xff] %v1068_v18 }
 0x21d   : > { %v1030_v19 = vpop.f32.mrf.mxu0  ;;  %v1071_v21 = vpop.f32.mrf.mxu1 }
 0x21e   : > { %1079 = vst [vmem:[%s1576_s18 + $0x28] sm:$0xff] %v1029_v16  ;;  %1081 = vst [vmem:[%s1576_s18 + $0x38] sm:$0xff] %v1070_v20 }
 0x21f   : > { %v1031_v22 = vpop.f32.mrf.mxu0  ;;  %v1072_v23 = vpop.f32.mrf.mxu1 }
 0x220 PF: > { %s20_s25 = sadd.s32 1, %s1456_s25   ;;  %s1686_s21 = smov %s1444_s22 }
 0x221   : > { %p17_p13 = scmp.ge.s32.totalorder %s20_s25, 4   ;;  %s1667_s22 = smov 0  }
 0x222   : > { %s1687_s23 = smov %s1452_s24  ;;  %s1688_s24 = smov %s1690_s27 }
 0x223   :  { %19 = sbr.rel (!%p17_p13) target bundleno = 4 (0x4), region = 117 }
 0x228   :  { %1135 = vsyncpa [#allocation3], 1 }
 0x229   :  { %1137 = vsyncpa [#allocation3 + $0x1], 1 }

</bundles_post_ra>
